<compile_context>
chip_gen: v7x
topology: tpu7x:2x2x1
jax: 0.10.0
libtpu: 0.0.40
codegen_flags: <defaults>
</compile_context>

<pallas_src>
import jax
import jax.numpy as jnp
from jax.experimental import pallas as pl
from jax.experimental.pallas import tpu as pltpu

LATENT_SIZE = 10
OUT_FEATURES = 28 * 28      # 784
MAX_TILE_B = 2048           # ~13 MiB double-buffered output tile: fits all gens
VMEM_LIMIT_BYTES = 48 * 1024 * 1024


def _round_up(n, m):
    return ((n + m - 1) // m) * m


def _choose_tiling(B):
    """Pick (tile_b, B_pad) for the batch dim.

    - tile_b is a multiple of 8 (sublanes).
    - For batches big enough to split we force >= 2 grid steps so v7x's two
      TensorCores both get work; steps are balanced so padding stays tiny.
    """
    B8 = _round_up(max(B, 1), 8)
    if B8 <= 16:  # tiny batch: a single 8/16-row step, nothing to split
        return B8, B8
    num_tiles = max(2, pl.cdiv(B8, MAX_TILE_B))
    tile_b = _round_up(pl.cdiv(B8, num_tiles), 8)
    B_pad = _round_up(B8, tile_b)
    return tile_b, B_pad


def decoder_kernel(x_ref, w_ref, b_ref, o_ref):
    # (tile_b, L) @ (L, 784) on the MXU with f32 accumulate; bias add on the
    # VPU; tanh on the EUP (native transcendental slot); one lane-dense store
    # per row-group (only the last of 7 output vregs is a 16-lane masked vst).
    y = jnp.dot(x_ref[...], w_ref[...], preferred_element_type=jnp.float32)
    o_ref[...] = jnp.tanh(y + b_ref[...]).astype(o_ref.dtype)


def decoder_forward(x, w_t, b):
    """x: (B, latent) f32, w_t: (latent, 784) f32, b: (784,) or (1, 784) f32
    -> (B, 784) f32 == tanh(x @ w_t + b)."""
    B, L = x.shape
    b2 = b.reshape(1, -1)

    tile_b, B_pad = _choose_tiling(B)
    x_p = x if B_pad == B else jnp.pad(x, ((0, B_pad - B), (0, 0)))
    grid = (B_pad // tile_b,)

    cost = pl.CostEstimate(
        flops=2 * B_pad * L * OUT_FEATURES,
        transcendentals=B_pad * OUT_FEATURES,
        bytes_accessed=4 * (B_pad * L + L * OUT_FEATURES + OUT_FEATURES
                            + B_pad * OUT_FEATURES),
    )

    out = pl.pallas_call(
        decoder_kernel,
        out_shape=jax.ShapeDtypeStruct((B_pad, OUT_FEATURES), jnp.float32),
        grid=grid,
        in_specs=[
            pl.BlockSpec((tile_b, L), lambda i: (i, 0)),          # batch tile (pipelined)
            pl.BlockSpec((L, OUT_FEATURES), lambda i: (0, 0)),    # W: VMEM-resident (~31 KB)
            pl.BlockSpec((1, OUT_FEATURES), lambda i: (0, 0)),    # b: VMEM-resident
        ],
        out_specs=pl.BlockSpec((tile_b, OUT_FEATURES), lambda i: (i, 0)),
        compiler_params=pltpu.CompilerParams(
            dimension_semantics=("parallel",),       # megacore split on v7x
            vmem_limit_bytes=VMEM_LIMIT_BYTES,       # allow 2048-row tiles everywhere
        ),
        cost_estimate=cost,
    )(x_p, w_t, b2)

    # Only batch padding (if any) is sliced away; feature dim is already 784.
    return out if B_pad == B else out[:B]


def init_params(key, latent_size=LATENT_SIZE, out_features=OUT_FEATURES):
    # Deterministic synthetic init mimicking nn.Linear's uniform(-1/sqrt(fan_in), ...)
    k_w, k_b = jax.random.split(key)
    bound = 1.0 / jnp.sqrt(latent_size)
    # PyTorch Linear weight is (out, in); we store its transpose (in, out).
    w_t = jax.random.uniform(k_w, (latent_size, out_features), jnp.float32,
                             minval=-bound, maxval=bound)
    b = jax.random.uniform(k_b, (1, out_features), jnp.float32,
                           minval=-bound, maxval=bound)
    return w_t, b


if __name__ == "__main__":
    key = jax.random.PRNGKey(0)
    k_params, k_x = jax.random.split(key)

    w_t, b = init_params(k_params)
    batch = 2  # tiny toy batch; tiling also handles large / odd batch sizes
    x = jax.random.normal(k_x, (batch, LATENT_SIZE), jnp.float32)

    out = decoder_forward(x, w_t, b)
    out = jax.block_until_ready(out)

    # Reference check in plain JAX.
    ref = jnp.tanh(x @ w_t + b)
    assert out.shape == (batch, OUT_FEATURES)
    assert jnp.allclose(out, ref, atol=1e-5, rtol=1e-5)

    print("KERNEL_OK")
</pallas_src>

<mosaic_0001>
module attributes {stable_mosaic.version = 11 : i64} {
  func.func @decoder_kernel(%arg0: i32, %arg1: memref<8x10xf32, #tpu.memory_space<vmem>>, %arg2: memref<10x784xf32, #tpu.memory_space<vmem>>, %arg3: memref<1x784xf32, #tpu.memory_space<vmem>>, %arg4: memref<8x784xf32, #tpu.memory_space<vmem>>) attributes {dimension_semantics = [#tpu.dimension_semantics<parallel>], iteration_bounds = array<i64: 1>, scalar_prefetch = 0 : i64, scratch_operands = 0 : i64, tpu.core_type = #tpu.core_type<tc>, window_params = [{transform_indices = @transform_0, window_bounds = array<i64: 8, 10>}, {pipeline_mode = #tpu.pipeline_mode<synchronous>, transform_indices = @transform_1, window_bounds = array<i64: 10, 784>}, {pipeline_mode = #tpu.pipeline_mode<synchronous>, transform_indices = @transform_2, window_bounds = array<i64: 1, 784>}, {transform_indices = @transform_3, window_bounds = array<i64: 8, 784>}]} {
    %c0 = arith.constant 0 : index
    %c0_0 = arith.constant 0 : index
    %0 = vector.load %arg1[%c0, %c0_0] : memref<8x10xf32, #tpu.memory_space<vmem>>, vector<8x10xf32>
    %c0_1 = arith.constant 0 : index
    %c0_2 = arith.constant 0 : index
    %1 = vector.load %arg2[%c0_1, %c0_2] : memref<10x784xf32, #tpu.memory_space<vmem>>, vector<10x784xf32>
    %cst = arith.constant dense<0.000000e+00> : vector<8x784xf32>
    %2 = tpu.matmul %0, %1, %cst {dimension_numbers = #tpu.dot_dimension_numbers<[1], [0], [0], [1], [0, 0, 1, 1], [], []>} : vector<8x10xf32>, vector<10x784xf32>, vector<8x784xf32> -> vector<8x784xf32>
    %c0_3 = arith.constant 0 : index
    %c0_4 = arith.constant 0 : index
    %3 = vector.load %arg3[%c0_3, %c0_4] : memref<1x784xf32, #tpu.memory_space<vmem>>, vector<1x784xf32>
    %4 = vector.broadcast %3 : vector<1x784xf32> to vector<8x784xf32>
    %5 = arith.addf %2, %4 : vector<8x784xf32>
    %6 = math.tanh %5 : vector<8x784xf32>
    %c0_5 = arith.constant 0 : index
    %c0_6 = arith.constant 0 : index
    %7 = vector.load %arg4[%c0_5, %c0_6] : memref<8x784xf32, #tpu.memory_space<vmem>>, vector<8x784xf32>
    tpu.vector_store %arg4[%c0_5, %c0_6], %6 {strides = array<i32>} : memref<8x784xf32, #tpu.memory_space<vmem>>, vector<8x784xf32>,
    return
  }
  func.func @transform_0(%arg0: i32) -> (i32, i32) {
    %c0_i32 = arith.constant 0 : i32
    %c0_i32_0 = arith.constant 0 : i32
    return %arg0, %c0_i32 : i32, i32
  }
  func.func @transform_1(%arg0: i32) -> (i32, i32) {
    %c0_i32 = arith.constant 0 : i32
    %c0_i32_0 = arith.constant 0 : i32
    %c0_i32_1 = arith.constant 0 : i32
    return %c0_i32, %c0_i32_0 : i32, i32
  }
  func.func @transform_2(%arg0: i32) -> (i32, i32) {
    %c0_i32 = arith.constant 0 : i32
    %c0_i32_0 = arith.constant 0 : i32
    %c0_i32_1 = arith.constant 0 : i32
    return %c0_i32, %c0_i32_0 : i32, i32
  }
  func.func @transform_3(%arg0: i32) -> (i32, i32) {
    %c0_i32 = arith.constant 0 : i32
    %c0_i32_0 = arith.constant 0 : i32
    return %arg0, %c0_i32 : i32, i32
  }
}

</mosaic_0001>

<bundles_post_ra>
// kernel: tpu_custom_call.1
= control target key start
LH: loop header
LB: loop body
LE: loop exit
PB: predicated region body
PF: predicated region fallthrough
CT: control target
= control target key end

     0   :  { %8 = vsyncpa [#allocation3], 0  ;;  %s668_s0 = inlined_call_operand.hbm [shape: f32[8,10], index: 0, kind: input, shape index: {}]   ;;  %s669_s1 = inlined_call_operand.hbm [shape: f32[10,784], index: 1, kind: input, shape index: {}]   ;;  %s670_s2 = inlined_call_operand.vmem [shape: f32[1,784], index: 2, kind: input, shape index: {}]   ;;  %s671_s3 = inlined_call_operand.hbm [shape: f32[8,784], index: 3, kind: output, shape index: {}]  }
   0x1   :  { %9 = vsyncpa [#allocation6], 0 }
   0x2   :  { %10 = vsyncpa [#allocation4], 0  ;;  %s571_s12 = smov [#allocation2]   ;;  %s572_s14 = smov [#allocation5]  }
   0x3   :  { %s17_s13 = sshll.u32 %s571_s12, 4  ;;  %s26_s15 = sshll.u32 %s572_s14, 4  ;;  %s18_s13 = int_to_ptr.vmem [resolvable:$true] %s17_s13  ;;  %s600_s15 = int_to_ptr.vmem [resolvable:$true] %s26_s15 }
   0x4   :  { %s499_s18 = scalar_lea.hbm %s668_s0, 128 }
   0x5   :  { %p500_p0 = scmp.ne.s32.totalorder %s668_s0, %s499_s18  ;;  %p503_p1 = scmp.lt.u32.totalorder %s499_s18, %s668_s0 }
   0x7   :  { %p505_p2 = pnand %p503_p1, %p500_p0 }
   0x9   :  { %508 = shalt.err (!%p505_p2)
}
   0xa   :  { %s509_s23 = scalar_lea.vmem %s18_s13, 128  ;;  %p514_p4 = scmp.lt.s32.totalorder %s18_s13, %s18_s13 }
   0xb   :  { %p510_p3 = scmp.ne.s32.totalorder %s18_s13, %s509_s23  ;;  %p515_p5 = scmp.lt.s32.totalorder %s509_s23, %s509_s23 }
   0xd   :  { %p516_p6 = por %p515_p5, %p514_p4 }
   0xf   :  { %p517_p7 = pnand %p516_p6, %p510_p3 }
  0x11   :  { %520 = shalt.err (!%p517_p7)
}
  0x12   :  { %20 = dma.hbm_to_vmem [thread:$0]  %s668_s0, 128, %s18_s13, [#allocation3]  }
  0x13   :  { %s521_s28 = scalar_lea.hbm %s669_s1, 1792 }
  0x14   :  { %p522_p8 = scmp.ne.s32.totalorder %s669_s1, %s521_s28  ;;  %p525_p9 = scmp.lt.u32.totalorder %s521_s28, %s669_s1 }
  0x16   :  { %p527_p10 = pnand %p525_p9, %p522_p8 }
  0x18   :  { %530 = shalt.err (!%p527_p10)
}
  0x19   :  { %s531_s6 = scalar_lea.vmem %s600_s15, 1792  ;;  %p536_p12 = scmp.lt.s32.totalorder %s600_s15, %s600_s15 }
  0x1a   :  { %p532_p11 = scmp.ne.s32.totalorder %s600_s15, %s531_s6  ;;  %p537_p13 = scmp.lt.s32.totalorder %s531_s6, %s531_s6 }
  0x1c   :  { %p538_p0 = por %p537_p13, %p536_p12 }
  0x1e   :  { %p539_p1 = pnand %p538_p0, %p532_p11 }
  0x20   :  { %542 = shalt.err (!%p539_p1)
}
  0x21   :  { %s573_s0 = smov 896   ;;  %s574_s7 = smov 56  }
  0x22   :  { %32 = dma.hbm_to_vmem [thread:$0]  %s669_s1, 1792, %s600_s15, [#allocation6], %s573_s0, %s573_s0, %s574_s7  }
  0x23   :  { %565 = dma.done.wait [#allocation3], 128  }
  0x24   :  { %566 = vsyncadd [#allocation3], 4294967168 }
  0x25   :  { %567 = dma.done.wait [#allocation6], 1792  }
  0x26   :  { %568 = vsyncadd [#allocation6], 4294965504  ;;  %v575_v0 = vmov 0.0   ;;  %vm97_vm0 = vcmask 1041408   ;;  %vm576_vm1 = vmmov 1   ;;  %v43_v2 = vld [vmem:[#allocation5 + $0x8] sm:$0xff]  ;;  %v58_v25 = vlaneseq }
  0x27   :  { %183 = vmatprep.mubr.f32.mxu0 %v575_v0  ;;  %254 = vmatprep.mubr.f32.mxu1 %v575_v0  ;;  %vm631_vm2 = vmpackc.low %vm97_vm0, %vm576_vm1  ;;  %v50_v3 = vld [vmem:[#allocation5 + $0x40] sm:$0x3]  ;;  %v49_v6 = vld [vmem:[#allocation5 + $0x38] sm:$0x3]  ;;  %vm93_vm3 = vcmask 80896   ;;  %v577_v24 = vmov 0.0|0.0  }
  0x28   :  { %v42_v4 = vld [vmem:[#allocation5] sm:$0xff]  ;;  %v454_v5 = vpack.c.bf16 %v50_v3, %v43_v2  ;;  %v45_v7 = vld [vmem:[#allocation5 + $0x18] sm:$0xff]  ;;  %v52_v8 = vld [vmem:[#allocation5 + $0x50] sm:$0x3]  ;;  %vm578_vm4 = vmmov 0   ;;  %v59_v26 = vshrl.u32 %v58_v25, 7 }
  0x29   :  { %v457_v9 = vpack.c.bf16 %v49_v6, %v42_v4  ;;  %v460_v10 = vpack.c.bf16 %v52_v8, %v45_v7  ;;  %v44_v11 = vld [vmem:[#allocation5 + $0x10] sm:$0xff]  ;;  %v51_v12 = vld [vmem:[#allocation5 + $0x48] sm:$0x3]  ;;  %v41_v13 = vld [vmem:[#allocation2] sm:$0xff]  ;;  %vm415_vm5 = vcmask 130048  }
  0x2a   :  { %456 = vmatprep.subr.msk.bf16.mxu0 %vm631_vm2, %v454_v5  ;;  %v463_v14 = vpack.c.bf16 %v51_v12, %v44_v11  ;;  %v47_v15 = vld [vmem:[#allocation5 + $0x28] sm:$0xff]  ;;  %v54_v16 = vld [vmem:[#allocation5 + $0x60] sm:$0x3]  ;;  %v53_v19 = vld [vmem:[#allocation5 + $0x58] sm:$0x3]  ;;  %v60_v27 = vsub.s32 0, %v59_v26 }
  0x2b   :  { %v46_v17 = vld [vmem:[#allocation5 + $0x20] sm:$0xff]  ;;  %459 = vmatpush1.bf16.msk.msra.mxu0 %vm631_vm2, %v457_v9  ;;  %462 = vmatprep.subr.msk.bf16.mxu1 %vm631_vm2, %v460_v10  ;;  %v466_v18 = vpack.c.bf16 %v54_v16, %v47_v15  ;;  %v48_v20 = vld [vmem:[#allocation5 + $0x30] sm:$0xff]  ;;  %v55_v21 = vld [vmem:[#allocation5 + $0x68] sm:$0x3]  ;;  %v64_v29 = vsub.s32 1, %v59_v26  ;;  %v68_v30 = vsub.s32 2, %v59_v26 }
  0x2c   :  { %465 = vmatpush1.bf16.msk.msra.mxu1 %vm631_vm2, %v463_v14  ;;  %v469_v22 = vpack.c.bf16 %v53_v19, %v46_v17  ;;  %v473_v23 = vpack.c.bf16 %v55_v21, %v48_v20  ;;  %v56_v28 = vld [vmem:[%s670_s2] sm:$0x7f]  ;;  %v72_v31 = vsub.s32 3, %v59_v26  ;;  %v76_v33 = vsub.s32 4, %v59_v26  ;;  %s579_s2 = smov [#allocation7]  }
  0x2d   :  { %468 = vmatprep.subr.msk.bf16.mxu0 %vm631_vm2, %v466_v18  ;;  %472 = vmatprep.subr.bf16.mxu1 %v577_v24  ;;  %v61_v32 = vrot.slane %v56_v28, %v60_v27  ;;  %v65_v34 = vrot.slane %v56_v28, %v64_v29  ;;  %v69_v35 = vrot.slane %v56_v28, %v68_v30  ;;  %v80_v36 = vsub.s32 5, %v59_v26  ;;  %s423_s11 = sshll.u32 %s579_s2, 4  ;;  %s424_s11 = int_to_ptr.vmem [resolvable:$true] %s423_s11 }
  0x2e   :  { %435 = vmatmul.mubr.msk.f32.vlgmr.msra.gmra.mrb[0].mxu0 %vm93_vm3, %v41_v13  ;;  %v84_v37 = vsub.s32 6, %v59_v26  ;;  %v73_v38 = vrot.slane %v56_v28, %v72_v31  ;;  %v77_v43 = vrot.slane %v56_v28, %v76_v33  ;;  %s543_s12 = scalar_lea.vmem %s424_s11, 896  ;;  %p548_p3 = scmp.lt.s32.totalorder %s424_s11, %s424_s11 }
  0x2f   :  { %438 = vmatmul.mubr.msk.f32.vlgmr.msra.gmra.mrb[0].mxu1 %vm93_vm3, %v41_v13  ;;  %471 = vmatpush1.bf16.msk.msra.mxu0 %vm631_vm2, %v469_v22  ;;  %v81_v47 = vrot.slane %v56_v28, %v80_v36  ;;  %p544_p2 = scmp.ne.s32.totalorder %s424_s11, %s543_s12  ;;  %p549_p4 = scmp.lt.s32.totalorder %s543_s12, %s543_s12 }
  0x30   :  { %475 = vmatpush3.bf16.msk.msra.mxu1 %vm631_vm2, %v473_v23  ;;  %325 = vmatprep.mubr.f32.mxu0 %v575_v0  ;;  %v85_v48 = vrot.slane %v56_v28, %v84_v37 }
  0x31   :  { %451 = vmatprep.mubr.msk.f32.mxu1 %vm578_vm4, %v575_v0  ;;  %p550_p5 = por %p549_p4, %p548_p3 }
  0x32   :  { %441 = vmatmul.mubr.msk.f32.vlgmr.msra.gmra.mrb[2].mxu0 %vm93_vm3, %v41_v13 }
  0x33   :  { %452 = vmatmul.mubr.msk.f32.vlgmr.msra.gmra.mrb[2].mxu1 %vm93_vm3, %v41_v13  ;;  %p551_p6 = pnand %p550_p5, %p544_p2 }
 0x101   :  { %v185_v39 = vpop.f32.mrb[0].mxu0 }
 0x102   :  { %v186_v40 = vadd.f32 %v185_v39, %v61_v32  ;;  %v187_v41 = vpop.f32.mrb[1].mxu0  ;;  %v256_v42 = vpop.f32.mrb[0].mxu1 }
 0x103   :  { %v188_v44 = vadd.f32 %v187_v41, %v65_v34  ;;  %v257_v45 = vadd.f32 %v256_v42, %v69_v35  ;;  %v258_v46 = vpop.f32.mrb[1].mxu1 }
 0x104   :  { %485 = vtanh.f32 %v186_v40  ;;  %v259_v49 = vadd.f32 %v258_v46, %v73_v38 }
 0x105   :  { %487 = vtanh.f32 %v188_v44  ;;  %v327_v50 = vpop.f32.mrb[2].mxu0 }
 0x106   :  { %489 = vtanh.f32 %v257_v45  ;;  %v328_v51 = vadd.f32 %v327_v50, %v77_v43  ;;  %v329_v52 = vpop.f32.mrb[3].mxu0  ;;  %v398_v53 = vpop.f32.mrb[2].mxu1 }
 0x107   :  { %491 = vtanh.f32 %v259_v49  ;;  %v330_v54 = vadd.f32 %v329_v52, %v81_v47  ;;  %v399_v55 = vadd.f32 %v398_v53, %v85_v48  ;;  %v453_v56 = vpop.f32.mrb[3].mxu1 }
 0x108   :  { %493 = vtanh.f32 %v328_v51 }
 0x109   :  { %495 = vtanh.f32 %v330_v54 }
 0x10a   :  { %497 = vtanh.f32 %v399_v55 }
 0x10e   :  { %v486_v57 = vpop.eup %485 }
 0x10f   :  { %v488_v58 = vpop.eup %487  ;;  %409 = vst [vmem:[#allocation7] sm:$0xff] %v486_v57 }
 0x110   :  { %v490_v59 = vpop.eup %489  ;;  %410 = vst [vmem:[#allocation7 + $0x8] sm:$0xff] %v488_v58 }
 0x111   :  { %v492_v60 = vpop.eup %491  ;;  %411 = vst [vmem:[#allocation7 + $0x10] sm:$0xff] %v490_v59 }
 0x112   :  { %v494_v61 = vpop.eup %493  ;;  %412 = vst [vmem:[#allocation7 + $0x18] sm:$0xff] %v492_v60 }
 0x113   :  { %v496_v62 = vpop.eup %495  ;;  %413 = vst [vmem:[#allocation7 + $0x20] sm:$0xff] %v494_v61 }
 0x114   :  { %v498_v63 = vpop.eup %497  ;;  %414 = vst [vmem:[#allocation7 + $0x28] sm:$0xff] %v496_v62 }
 0x115   :  { %416 = vst.msk [vmem:[#allocation7 + $0x30] sm:$0xff] %vm415_vm5, %v498_v63 }
 0x116   :  { %554 = shalt.err (!%p551_p6)
}
 0x117   :  { %s555_s15 = scalar_lea.hbm %s671_s3, 896 }
 0x118   :  { %p556_p7 = scmp.ne.s32.totalorder %s671_s3, %s555_s15  ;;  %p559_p8 = scmp.lt.u32.totalorder %s555_s15, %s671_s3 }
 0x11a   :  { %p561_p9 = pnand %p559_p8, %p556_p7 }
 0x11c   :  { %564 = shalt.err (!%p561_p9)
}
 0x11d   :  { %426 = dma.vmem_to_hbm [thread:$0]  %s424_s11, 896, %s671_s3, [#allocation4]  }
 0x11e   :  { %569 = dma.done.wait [#allocation4], 896  }
 0x11f   :  { %570 = vsyncadd [#allocation4], 4294966400 }
 0x120   :  { %430 = vsyncpa [#allocation3], 1 }
 0x121   :  { %431 = vsyncpa [#allocation6], 1 }
 0x122   :  { %432 = vsyncpa [#allocation4], 1 }

</bundles_post_ra>
